<compile_context>
chip_gen: v7x
topology: tpu7x:2x2x1
jax: 0.10.0
libtpu: 0.0.40
codegen_flags: <defaults>
</compile_context>

<pallas_src>
import jax
import jax.numpy as jnp
from jax.experimental import pallas as pl
from jax.experimental.pallas import tpu as pltpu


def _round_up(x, m):
    return ((x + m - 1) // m) * m


def _choose_tiles(T, N, itemsize, *, target_bytes=8 << 20, max_cw=8192,
                  block_rows=None, block_cols=None):
    """Pick an (RB, CW) tile for the (T, N) diff reduction.

    CW: lane (last-dim) tile, multiple of 128 (or the full unpadded N).
    RB: sublane (row) tile, multiple of 8/16/32 by dtype (or the full unpadded T).
    Returns (RB, CW, Tpad, Npad, grid_rows, grid_cols).
    """
    # ---- columns (lane axis) ----
    if block_cols is not None:
        assert block_cols % 128 == 0, "block_cols must be a multiple of 128"
        CW = block_cols
        Npad = _round_up(N, CW)
        grid_cols = Npad // CW
    else:
        n128 = _round_up(N, 128)
        if n128 <= max_cw:
            CW, Npad, grid_cols = N, N, 1                  # full width, no padding
        else:
            grid_cols = pl.cdiv(n128, max_cw)
            CW = _round_up(pl.cdiv(n128, grid_cols), 128)  # balanced lane tiles
            Npad = CW * grid_cols

    # ---- rows (sublane axis) ----
    sub = 8 * max(1, 4 // itemsize)                        # 8 f32 / 16 bf16 / 32 8-bit
    if block_rows is not None:
        if block_rows >= T:
            RB, grid_rows, Tpad = T, 1, T
        else:
            assert block_rows % sub == 0, "block_rows must be a sublane multiple"
            RB = block_rows
            grid_rows = pl.cdiv(T, RB)
            Tpad = RB * grid_rows
    else:
        target_elems = max(1, target_bytes // itemsize)
        rb = max(sub, (target_elems // max(CW, 1)) // sub * sub)
        if rb >= T:
            RB, grid_rows, Tpad = T, 1, T                  # full height, no padding
        else:
            grid_rows = pl.cdiv(T, rb)
            RB = _round_up(pl.cdiv(T, grid_rows), sub)     # balanced row tiles
            grid_rows = pl.cdiv(T, RB)
            Tpad = RB * grid_rows

    return RB, CW, Tpad, Npad, grid_rows, grid_cols


def _make_diff_kernel(RB, CW, acc_rows):
    fold8 = acc_rows == 8                                  # RB is a multiple of 8

    def kernel(src_ref, out_ref):
        s = src_ref[...].astype(jnp.float32)               # (RB, CW) tile
        if fold8:
            # d[i] = s[i] - s[i-1]; row 0 is masked out (row-block boundaries are
            # handled in the wrapper). XLU roll instead of two sublane-shifted
            # slice materializations.
            prev = pltpu.roll(s, shift=1, axis=0)
            row = jax.lax.broadcasted_iota(jnp.int32, (RB, CW), 0)
            a = jnp.where(row == 0, 0.0, jnp.abs(s - prev))
            # Fold RB -> 8 sublanes with pure VPU vreg adds (reshape is a view of
            # the native (8, 128) tiling); no per-step cross-lane reduce.
            part = jnp.sum(a.reshape(RB // 8, 8, CW), axis=0)
        else:
            # Single-block small path (RB == T, not a sublane multiple).
            a = jnp.abs(s[1:, :] - s[:-1, :])
            part = jnp.sum(a, axis=0, keepdims=True)
        out_ref[...] = part[None, None, :, :]              # lane-dense partial sums

    return kernel


def prob_smooth_loss(logits, smoothed_src, *, block_rows=None, block_cols=None):
    """Pallas implementation of ProbSmoothLoss.forward. Returns a scalar f32.

    logits:       (B, T)
    smoothed_src: (T, B, D)
    """
    B, T = logits.shape
    Ts, Bs, D = smoothed_src.shape
    assert Ts == T and Bs == B, "shape mismatch between logits and smoothed_src"
    assert T >= 2, "need at least 2 time steps"
    # torch broadcasting of (B, T-1) against (T-1, B, D) is only valid when:
    assert D == T - 1 or D == 1 or T == 2, "shapes not broadcastable (torch would raise)"

    N = B * D
    itemsize = jnp.dtype(smoothed_src.dtype).itemsize
    src2d = smoothed_src.reshape(T, N)                     # free reshape; lane axis = B*D

    RB, CW, Tpad, Npad, grid_rows, grid_cols = _choose_tiles(
        T, N, itemsize, block_rows=block_rows, block_cols=block_cols)

    # Pad so every tile is full: extra columns are zeros (|diff| contribution 0),
    # extra rows replicate the last row (|diff| contribution 0). Both exact.
    src_p = src2d
    if Npad != N:
        src_p = jnp.pad(src_p, ((0, 0), (0, Npad - N)))
    if Tpad != T:
        src_p = jnp.pad(src_p, ((0, Tpad - T), (0, 0)), mode="edge")

    acc_rows = 8 if RB % 8 == 0 else 1
    kernel = _make_diff_kernel(RB, CW, acc_rows)

    tile_bytes = RB * CW * itemsize
    out_block_bytes = acc_rows * CW * 4
    vmem_limit = int(max(16 << 20,
                         min(2 * tile_bytes + 2 * out_block_bytes + (4 << 20),
                             100 << 20)))

    cost = pl.CostEstimate(
        flops=3 * Tpad * Npad,
        transcendentals=0,
        bytes_accessed=itemsize * Tpad * Npad + 4 * grid_cols * grid_rows * acc_rows * CW,
    )

    parts = pl.pallas_call(
        kernel,
        out_shape=jax.ShapeDtypeStruct((grid_cols, grid_rows, acc_rows, CW), jnp.float32),
        grid_spec=pltpu.PrefetchScalarGridSpec(
            num_scalar_prefetch=0,
            grid=(grid_cols, grid_rows),
            in_specs=[pl.BlockSpec((RB, CW), lambda j, r: (r, j))],
            out_specs=pl.BlockSpec((1, 1, acc_rows, CW), lambda j, r: (j, r, 0, 0)),
        ),
        compiler_params=pltpu.CompilerParams(
            # Every tile is independent -> both axes parallel so v7x can shard the
            # streaming reduce across its 2 TensorCores; neutral on v5e/v6e.
            dimension_semantics=("parallel", "parallel"),
            vmem_limit_bytes=vmem_limit,
        ),
        cost_estimate=cost,
    )(src_p)

    # |diff| across row-block boundaries: 2*(grid_rows-1) rows, done in plain XLA.
    diff_sum = jnp.sum(parts)
    if grid_rows > 1:
        tops = src_p[RB::RB, :].astype(jnp.float32)          # rows RB, 2RB, ...
        bots = src_p[RB - 1:Tpad - 1:RB, :].astype(jnp.float32)
        diff_sum = diff_sum + jnp.sum(jnp.abs(tops - bots))

    # Tiny (B, T-1) logits product term: plain XLA, kept out of the kernel epilogue.
    lg = logits.astype(jnp.float32)
    logit_mean = jnp.mean(lg[:, 1:] * lg[:, :-1])

    return logit_mean + diff_sum / jnp.float32((T - 1) * N)


def _reference(logits, smoothed_src):
    """Pure-JAX reference with the exact broadcasting semantics of the torch module."""
    s1 = smoothed_src[1:, :, :]
    s2 = smoothed_src[:-1, :, :]
    probs = logits[:, 1:] * logits[:, :-1] + jnp.sqrt((s1 - s2) ** 2)
    return jnp.mean(probs)


if __name__ == "__main__":
    key = jax.random.PRNGKey(0)
    k1, k2, k3, k4 = jax.random.split(key, 4)

    # Case 1: small shapes; D == T-1 so the torch broadcast in the reference is
    # elementwise along the last dim. Exercises the single-tile fast path.
    B, T, D = 4, 9, 8
    logits = jax.random.uniform(k1, (B, T), dtype=jnp.float32)
    smoothed_src = jax.random.normal(k2, (T, B, D), dtype=jnp.float32)

    loss = jax.block_until_ready(prob_smooth_loss(logits, smoothed_src))

    # TODO(synk): the module raises ValueError via torch.any(torch.isnan(probs)); a
    # data-dependent Python raise has no in-kernel equivalent, so the (equivalent)
    # NaN-ness of the reduced loss is checked host-side instead.
    if bool(jnp.isnan(loss)):
        raise ValueError("Probs has NaNs")
    ref = _reference(logits, smoothed_src)
    assert jnp.allclose(loss, ref, atol=1e-5, rtol=1e-4), (loss, ref)

    # Case 2: forces the tiled path (multiple row/column blocks, zero-padded lanes,
    # edge-padded rows, roll-based diff, wrapper boundary term) at still-small shapes.
    B2, T2, D2 = 5, 33, 32
    logits2 = jax.random.uniform(k3, (B2, T2), dtype=jnp.float32)
    smoothed_src2 = jax.random.normal(k4, (T2, B2, D2), dtype=jnp.float32)

    loss2 = jax.block_until_ready(
        prob_smooth_loss(logits2, smoothed_src2, block_rows=16, block_cols=128))
    if bool(jnp.isnan(loss2)):
        raise ValueError("Probs has NaNs")
    ref2 = _reference(logits2, smoothed_src2)
    assert jnp.allclose(loss2, ref2, atol=1e-5, rtol=1e-4), (loss2, ref2)

    print("KERNEL_OK")
</pallas_src>

<mosaic_0001>
module attributes {stable_mosaic.version = 11 : i64} {
  func.func @kernel(%arg0: i32, %arg1: i32, %arg2: memref<9x32xf32, #tpu.memory_space<vmem>>, %arg3: memref<1x1x1x32xf32, #tpu.memory_space<vmem>>) attributes {dimension_semantics = [#tpu.dimension_semantics<parallel>, #tpu.dimension_semantics<parallel>], iteration_bounds = array<i64: 1, 1>, scalar_prefetch = 0 : i64, scratch_operands = 0 : i64, tpu.core_type = #tpu.core_type<tc>, window_params = [{transform_indices = @transform_0, window_bounds = array<i64: 9, 32>}, {transform_indices = @transform_1, window_bounds = array<i64: 1, 1, 1, 32>}]} {
    %c0 = arith.constant 0 : index
    %c0_0 = arith.constant 0 : index
    %0 = vector.load %arg2[%c0, %c0_0] : memref<9x32xf32, #tpu.memory_space<vmem>>, vector<9x32xf32>
    %1 = vector.extract_strided_slice %0 {offsets = [1, 0], sizes = [8, 32], strides = [1, 1]} : vector<9x32xf32> to vector<8x32xf32>
    %2 = vector.extract_strided_slice %0 {offsets = [0, 0], sizes = [8, 32], strides = [1, 1]} : vector<9x32xf32> to vector<8x32xf32>
    %3 = arith.subf %1, %2 : vector<8x32xf32>
    %4 = math.absf %3 : vector<8x32xf32>
    %cst = arith.constant dense<0.000000e+00> : vector<32xf32>
    %5 = vector.multi_reduction <add>, %4, %cst [0] : vector<8x32xf32> to vector<32xf32>
    %6 = vector.shape_cast %5 : vector<32xf32> to vector<1x32xf32>
    %7 = vector.shape_cast %6 : vector<1x32xf32> to vector<1x1x1x32xf32>
    %c0_1 = arith.constant 0 : index
    %c0_2 = arith.constant 0 : index
    %c0_3 = arith.constant 0 : index
    %c0_4 = arith.constant 0 : index
    %8 = vector.load %arg3[%c0_1, %c0_2, %c0_3, %c0_4] : memref<1x1x1x32xf32, #tpu.memory_space<vmem>>, vector<1x1x1x32xf32>
    tpu.vector_store %arg3[%c0_1, %c0_2, %c0_3, %c0_4], %7 {strides = array<i32>} : memref<1x1x1x32xf32, #tpu.memory_space<vmem>>, vector<1x1x1x32xf32>,
    return
  }
  func.func @transform_0(%arg0: i32, %arg1: i32) -> (i32, i32) {
    %c0_i32 = arith.constant 0 : i32
    return %arg1, %arg0 : i32, i32
  }
  func.func @transform_1(%arg0: i32, %arg1: i32) -> (i32, i32, i32, i32) {
    %c0_i32 = arith.constant 0 : i32
    %c0_i32_0 = arith.constant 0 : i32
    %c0_i32_1 = arith.constant 0 : i32
    return %arg0, %arg1, %c0_i32, %c0_i32_0 : i32, i32, i32, i32
  }
}

</mosaic_0001>

<bundles_post_ra>
// kernel: tpu_custom_call.1
= control target key start
LH: loop header
LB: loop body
LE: loop exit
PB: predicated region body
PF: predicated region fallthrough
CT: control target
= control target key end

     0   :  { %6 = vsyncpa [#allocation3], 0  ;;  %s154_s0 = inlined_call_operand.hbm [shape: f32[9,32], index: 0, kind: input, shape index: {}]   ;;  %s155_s1 = inlined_call_operand.hbm [shape: f32[1,1,1,32], index: 1, kind: output, shape index: {}]  }
   0x1   :  { %7 = vsyncpa [#allocation4], 0  ;;  %s116_s6 = smov [#allocation2]   ;;  %s68_s10 = scalar_lea.hbm %s154_s0, 256 }
   0x2   :  { %s13_s7 = sshll.u32 %s116_s6, 4  ;;  %p69_p0 = scmp.ne.s32.totalorder %s154_s0, %s68_s10  ;;  %s14_s7 = int_to_ptr.vmem [resolvable:$true] %s13_s7 }
   0x3   :  { %p72_p1 = scmp.lt.u32.totalorder %s68_s10, %s154_s0 }
   0x5   :  { %p74_p2 = pnand %p72_p1, %p69_p0 }
   0x7   :  { %77 = shalt.err (!%p74_p2)
}
   0x8   :  { %s78_s15 = scalar_lea.vmem %s14_s7, 256  ;;  %p83_p4 = scmp.lt.s32.totalorder %s14_s7, %s14_s7 }
   0x9   :  { %p79_p3 = scmp.ne.s32.totalorder %s14_s7, %s78_s15  ;;  %p84_p5 = scmp.lt.s32.totalorder %s78_s15, %s78_s15 }
   0xb   :  { %p85_p6 = por %p84_p5, %p83_p4 }
   0xd   :  { %p86_p7 = pnand %p85_p6, %p79_p3 }
   0xf   :  { %89 = shalt.err (!%p86_p7)
}
  0x10   :  { %s117_s16 = smov 128   ;;  %s118_s17 = smov 8  }
  0x11   :  { %19 = dma.hbm_to_vmem [thread:$0]  %s154_s0, 256, %s14_s7, [#allocation3], %s117_s16, %s117_s16, %s118_s17  }
  0x12   :  { %112 = dma.done.wait [#allocation3], 256  }
  0x13   :  { %113 = vsyncadd [#allocation3], 4294967040  ;;  %v23_v0 = vld [vmem:[#allocation2] sm:$0xff]  ;;  %v24_v1 = vld [vmem:[#allocation2 + $0x8] sm:$0x1]  ;;  %vm34_vm0 = vcmask 1046528  }
  0x14   :  { %v26_v2 = vrot.slane %v23_v0, 7  ;;  %vm39_vm1 = vcmask 261120   ;;  %s119_s0 = smov [#allocation5]   ;;  %vm47_vm2 = vcmask 253952  }
  0x15   :  { %s55_s20 = sshll.u32 %s119_s0, 4  ;;  %s56_s20 = int_to_ptr.vmem [resolvable:$true] %s55_s20 }
  0x16   :  { %v28_v3 = vsub.f32 %v23_v0, %v26_v2  ;;  %v29_v4 = vsub.f32 %v24_v1, %v26_v2  ;;  %s90_s21 = scalar_lea.vmem %s56_s20, 16  ;;  %s94_s22 = scalar_lea.vmem %s56_s20, 32 }
  0x17   :  { %p91_p8 = scmp.ne.s32.totalorder %s56_s20, %s90_s21  ;;  %p95_p9 = scmp.lt.s32.totalorder %s56_s20, %s56_s20 }
  0x18   :  { %v30_v5 = vand.u32 2147483647, %v28_v3  ;;  %v31_v6 = vand.u32 2147483647, %v29_v4  ;;  %p96_p10 = scmp.lt.s32.totalorder %s94_s22, %s90_s21 }
  0x1a   :  { %v35_v7 = vrot.slane %v30_v5, 1  ;;  %v36_v8 = vrot.slane %v31_v6, 1  ;;  %p97_p11 = por %p96_p10, %p95_p9 }
  0x1c   :  { %v37_v9 = vsel %vm34_vm0, %v35_v7, %v36_v8  ;;  %p98_p12 = pnand %p97_p11, %p91_p8 }
  0x1d   :  { %v40_v10 = vsel %vm39_vm1, %v37_v9, 0.0 }
  0x1e   :  { %v41_v11 = vrot.slane %v40_v10, 4 }
  0x20   :  { %v42_v12 = vadd.f32 %v41_v11, %v40_v10 }
  0x22   :  { %v43_v13 = vrot.slane %v42_v12, 2 }
  0x24   :  { %v44_v14 = vadd.f32 %v43_v13, %v42_v12 }
  0x26   :  { %v45_v15 = vrot.slane %v44_v14, 1 }
  0x28   :  { %v46_v16 = vadd.f32 %v45_v15, %v44_v14 }
  0x2a   :  { %48 = vst.msk [vmem:[#allocation5] sm:$0x1] %vm47_vm2, %v46_v16 }
  0x2b   :  { %101 = shalt.err (!%p98_p12)
}
  0x2c   :  { %s102_s25 = scalar_lea.hbm %s155_s1, 16 }
  0x2d   :  { %p103_p13 = scmp.ne.s32.totalorder %s155_s1, %s102_s25  ;;  %p106_p0 = scmp.lt.u32.totalorder %s102_s25, %s155_s1 }
  0x2f   :  { %p108_p1 = pnand %p106_p0, %p103_p13 }
  0x31   :  { %111 = shalt.err (!%p108_p1)
}
  0x32   :  { %58 = dma.vmem_to_hbm [thread:$0]  %s56_s20, 16, %s155_s1, [#allocation4]  }
  0x33   :  { %114 = dma.done.wait [#allocation4], 16  }
  0x34   :  { %115 = vsyncadd [#allocation4], 4294967280 }
  0x35   :  { %62 = vsyncpa [#allocation3], 1 }
  0x36   :  { %63 = vsyncpa [#allocation4], 1 }

</bundles_post_ra>
